<compile_context>
chip_gen: v5e
topology: v5e:2x2
jax: 0.10.0
libtpu: 0.0.40
codegen_flags: <defaults>
</compile_context>

<pallas_src>
import math
import functools

import numpy as np

import jax
import jax.numpy as jnp
from jax.experimental import pallas as pl
from jax.experimental.pallas import tpu as pltpu

REL_BOTTLENECK = 512          # Relation.__init__ default bottleneck_dim
LANE = 128
SUBLANE = 8
MAX_ROW_TILE = 512


# ----------------------------- small helpers ---------------------------------

def _cdiv(a, b):
    return -(-a // b)


def _round_up(x, m):
    return _cdiv(x, m) * m


def _choose_row_tiling(R):
    """Row tile / padded-rows choice.

    * per-tile rows <= MAX_ROW_TILE (VMEM),
    * at least 2 row tiles whenever R > SUBLANE so the 'parallel' grid axis can be
      sharded across v7x's two TensorCores (no-op cost on 1-TC v5e/v6e),
    * padding bounded by num_tiles * SUBLANE instead of up to a full 512-row tile.
    """
    nt = _cdiv(R, MAX_ROW_TILE)
    if nt < 2 and R > SUBLANE:
        nt = 2
    nt = max(nt, 1)
    tm = _round_up(_cdiv(R, nt), SUBLANE)
    nt = _cdiv(R, tm)
    return tm, nt * tm


def _pad_rows(x, Rp):
    R = x.shape[0]
    return x if Rp == R else jnp.pad(x, ((0, Rp - R), (0, 0)))


def _pad_last(a, to):
    pad = to - a.shape[-1]
    if pad == 0:
        return a
    return jnp.pad(a, [(0, 0)] * (a.ndim - 1) + [(0, pad)])


@functools.lru_cache(maxsize=None)
def _vmem_limit_bytes():
    """Generation-aware scoped-VMEM limit: ~half of physical, clamped to [32, 96] MiB."""
    cap = 64 * 1024 * 1024
    try:
        info_fn = getattr(pltpu, "get_tpu_info", None)
        if info_fn is not None:
            cap = int(info_fn().vmem_capacity_bytes)
    except Exception:
        pass
    return int(min(max(cap // 2, 32 * 1024 * 1024), 96 * 1024 * 1024))


# ----------------------------- Pallas kernels --------------------------------

def _relation_mlp_kernel(x_ref, w1_ref, b1_ref, w2_ref, b2_ref, o_ref):
    """Relation MLP: ReLU -> Linear(Din,H) -> ReLU -> Linear(H, Dp).

    Weights are bf16, accumulation is f32; Dp is lane-padded (unmasked stores).
    """
    x = jnp.maximum(x_ref[...], 0.0).astype(jnp.bfloat16)
    h = jnp.dot(x, w1_ref[...], preferred_element_type=jnp.float32) + b1_ref[...]
    h = jnp.maximum(h, 0.0).astype(jnp.bfloat16)
    y = jnp.dot(h, w2_ref[...], preferred_element_type=jnp.float32) + b2_ref[...]
    o_ref[...] = y.astype(o_ref.dtype)


def _relation_level_kernel(x_ref, w1_ref, b1_ref, wc_ref, bc_ref, rel_ref, lin_ref):
    """Fused per-level block.

    The level Linear is folded into the Relation's second layer (wc = [w2 | w2@lw],
    bc = [b2 | b2@lw + lb]); a single (tm,H) x (H, Fp+Op) MXU matmul produces both
    `rel` and `lin`, split at a lane-aligned boundary into two lane-dense outputs.
    """
    x = jnp.maximum(x_ref[...], 0.0).astype(jnp.bfloat16)
    h = jnp.dot(x, w1_ref[...], preferred_element_type=jnp.float32) + b1_ref[...]
    h = jnp.maximum(h, 0.0).astype(jnp.bfloat16)
    y = jnp.dot(h, wc_ref[...], preferred_element_type=jnp.float32) + bc_ref[...]
    fp = rel_ref.shape[-1]
    rel_ref[...] = y[:, :fp].astype(rel_ref.dtype)
    lin_ref[...] = y[:, fp:].astype(lin_ref.dtype)


# ----------------------------- Pallas wrappers --------------------------------

def relation_mlp(x, w1, b1, w2p, b2p, out_features):
    """x: (R, Din) -> (R, out_features). Params must come from prepare_relation_params."""
    R, Din = x.shape
    H = w1.shape[1]
    Dp = w2p.shape[1]
    tm, Rp = _choose_row_tiling(R)
    xp = _pad_rows(x, Rp)
    # TODO(synk): for very large Din (real TRN widths) on v7x, add a trailing "arbitrary"
    # K grid axis with an f32 VMEM accumulator (K-tiling) and single-buffer the
    # grid-invariant weight specs; bf16 weights already keep typical widths inside VMEM.
    out = pl.pallas_call(
        _relation_mlp_kernel,
        out_shape=jax.ShapeDtypeStruct((Rp, Dp), x.dtype),
        grid_spec=pltpu.PrefetchScalarGridSpec(
            num_scalar_prefetch=0,
            grid=(Rp // tm,),
            in_specs=[
                pl.BlockSpec((tm, Din), lambda i: (i, 0)),
                pl.BlockSpec((Din, H), lambda i: (0, 0)),
                pl.BlockSpec((1, H), lambda i: (0, 0)),
                pl.BlockSpec((H, Dp), lambda i: (0, 0)),
                pl.BlockSpec((1, Dp), lambda i: (0, 0)),
            ],
            out_specs=pl.BlockSpec((tm, Dp), lambda i: (i, 0)),
        ),
        compiler_params=pltpu.CompilerParams(
            dimension_semantics=("parallel",),
            vmem_limit_bytes=_vmem_limit_bytes()),
    )(xp, w1, b1, w2p, b2p)
    return out[:R, :out_features]


def relation_level(x, w1, b1, wc, bc, rel_features, out_features):
    """x: (R, rs*F) -> (rel (R, F), lin (R, out)) via one fused Pallas call."""
    R, Din = x.shape
    H = w1.shape[1]
    Fp = _round_up(rel_features, LANE)
    Cp = wc.shape[1]           # Fp + Op (both 128-multiples)
    Op = Cp - Fp
    tm, Rp = _choose_row_tiling(R)
    xp = _pad_rows(x, Rp)
    rel, lin = pl.pallas_call(
        _relation_level_kernel,
        out_shape=(jax.ShapeDtypeStruct((Rp, Fp), x.dtype),
                   jax.ShapeDtypeStruct((Rp, Op), x.dtype)),
        grid_spec=pltpu.PrefetchScalarGridSpec(
            num_scalar_prefetch=0,
            grid=(Rp // tm,),
            in_specs=[
                pl.BlockSpec((tm, Din), lambda i: (i, 0)),
                pl.BlockSpec((Din, H), lambda i: (0, 0)),
                pl.BlockSpec((1, H), lambda i: (0, 0)),
                pl.BlockSpec((H, Cp), lambda i: (0, 0)),
                pl.BlockSpec((1, Cp), lambda i: (0, 0)),
            ],
            out_specs=[
                pl.BlockSpec((tm, Fp), lambda i: (i, 0)),
                pl.BlockSpec((tm, Op), lambda i: (i, 0)),
            ],
        ),
        compiler_params=pltpu.CompilerParams(
            dimension_semantics=("parallel",),
            vmem_limit_bytes=_vmem_limit_bytes()),
    )(xp, w1, b1, wc, bc)
    return rel[:R, :rel_features], lin[:R, :out_features]


# ------------------------- one-time parameter prep ----------------------------

def prepare_relation_params(w1, b1, w2, b2):
    """Pad to lane-dense widths and cast weights to bf16 (done once, outside jit)."""
    H = w1.shape[1]
    Dp = _round_up(w2.shape[1], LANE)
    return dict(
        w1=w1.astype(jnp.bfloat16),
        b1=b1.reshape(1, H).astype(jnp.float32),
        w2=_pad_last(w2, Dp).astype(jnp.bfloat16),
        b2=_pad_last(b2.reshape(1, -1), Dp).astype(jnp.float32),
    )


def prepare_level_params(w1, b1, w2, b2, lw, lb):
    """Fold the level Linear into the Relation's 2nd layer; pad + cast (outside jit)."""
    H = w1.shape[1]
    F = w2.shape[1]
    Do = lw.shape[1]
    Fp = _round_up(F, LANE)
    Op = _round_up(Do, LANE)
    wc = jnp.concatenate([_pad_last(w2, Fp), _pad_last(w2 @ lw, Op)], axis=1)
    bc = jnp.concatenate([_pad_last(b2.reshape(1, -1), Fp),
                          _pad_last((b2 @ lw + lb).reshape(1, -1), Op)], axis=1)
    return dict(
        w1=w1.astype(jnp.bfloat16),
        b1=b1.reshape(1, H).astype(jnp.float32),
        wc=wc.astype(jnp.bfloat16),
        bc=bc.astype(jnp.float32),
    )


def prepare_params(raw):
    levels = [prepare_level_params(l["rel_w1"], l["rel_b1"], l["rel_w2"], l["rel_b2"],
                                   l["lin_w"], l["lin_b"]) for l in raw["levels"]]
    final = prepare_relation_params(raw["final"]["w1"], raw["final"]["b1"],
                                    raw["final"]["w2"], raw["final"]["b2"])
    return dict(levels=levels, final=final)


# ----------------------------- forward pass -----------------------------------

def _forward_impl(x, params, *, num_inputs, in_features, out_features,
                  relation_size, level_fn, relation_fn):
    # input.view(-1, num_inputs, in_features)
    cur = x.reshape(-1, num_inputs, in_features)             # (B, N, F)
    B = cur.shape[0]
    outs = []
    # TODO(synk): the overlapping windows are still materialized wrapper-side
    # (relation_size x HBM duplication); an in-kernel gather (pl.Element on the sequence
    # axis / manual DMA from a pl.ANY ref) would remove it, but this path is only
    # reachable for depth >= 1, where the reference's torch.stack(outs) itself raises.
    for lvl in params["levels"]:
        T = cur.shape[1]
        n_win = T - relation_size + 1                        # consecutive sliding windows
        wins = jnp.stack([cur[:, i:i + relation_size] for i in range(n_win)], axis=1)
        flat = wins.reshape(B * n_win, relation_size * in_features)
        rel, lin = level_fn(flat, lvl)                       # (B*n_win, F), (B*n_win, out)
        # torch.stack([... (B,1,F) ...], 1) -> (B, n_win, 1, F)
        cur = rel.reshape(B, n_win, 1, in_features)
        # linear(input).sum(-2): Linear on the last dim, summed over the size-1 dim.
        outs.append(lin.reshape(B, n_win, 1, out_features).sum(axis=-2))
    # final relation over whatever sequence is left
    flat = cur.reshape(B, -1)
    fin = relation_fn(flat, params["final"])                 # (B, out)
    outs.append(fin.reshape(B, 1, out_features))
    # torch.stack(outs).mean(0)  (requires equal shapes, exactly like the reference)
    return jnp.stack(outs).mean(axis=0)


def hierarchical_relation_forward(x, kparams, *, num_inputs, in_features,
                                  out_features, relation_size):
    def level_fn(flat, lvl):
        return relation_level(flat, lvl["w1"], lvl["b1"], lvl["wc"], lvl["bc"],
                              in_features, out_features)

    def relation_fn(flat, fin):
        return relation_mlp(flat, fin["w1"], fin["b1"], fin["w2"], fin["b2"], out_features)

    return _forward_impl(x, kparams, num_inputs=num_inputs, in_features=in_features,
                         out_features=out_features, relation_size=relation_size,
                         level_fn=level_fn, relation_fn=relation_fn)


# pure-JAX fp32 reference (same math, no Pallas, un-fused) for validation
def _ref_relation_mlp(x, w1, b1, w2, b2):
    h = jnp.maximum(jnp.dot(jnp.maximum(x, 0.0), w1) + b1, 0.0)
    return jnp.dot(h, w2) + b2


def reference_forward(x, raw_params, *, num_inputs, in_features, out_features,
                      relation_size):
    def level_fn(flat, lvl):
        rel = _ref_relation_mlp(flat, lvl["rel_w1"], lvl["rel_b1"],
                                lvl["rel_w2"], lvl["rel_b2"])
        return rel, jnp.dot(rel, lvl["lin_w"]) + lvl["lin_b"]

    def relation_fn(flat, fin):
        return _ref_relation_mlp(flat, fin["w1"], fin["b1"], fin["w2"], fin["b2"])

    return _forward_impl(x, raw_params, num_inputs=num_inputs, in_features=in_features,
                         out_features=out_features, relation_size=relation_size,
                         level_fn=level_fn, relation_fn=relation_fn)


# ----------------------------- parameter init ---------------------------------

def _linear_init(key, fan_in, fan_out):
    """PyTorch nn.Linear default init (U(-1/sqrt(fan_in), ...)), weights stored (in, out)."""
    kw, kb = jax.random.split(key)
    bound = 1.0 / math.sqrt(fan_in)
    w = jax.random.uniform(kw, (fan_in, fan_out), jnp.float32, -bound, bound)
    b = jax.random.uniform(kb, (fan_out,), jnp.float32, -bound, bound)
    return w, b


def init_params(key, num_inputs, in_features, out_features, relation_size):
    depth = int(np.ceil((num_inputs - relation_size) / (relation_size - 1)))
    num_inputs_final = num_inputs + depth * (1 - relation_size)
    keys = jax.random.split(key, 3 * depth + 2)
    ki = 0
    levels = []
    for _ in range(depth):
        w1, b1 = _linear_init(keys[ki], relation_size * in_features, REL_BOTTLENECK); ki += 1
        w2, b2 = _linear_init(keys[ki], REL_BOTTLENECK, in_features); ki += 1
        lw, lb = _linear_init(keys[ki], in_features, out_features); ki += 1
        levels.append(dict(rel_w1=w1, rel_b1=b1, rel_w2=w2, rel_b2=b2, lin_w=lw, lin_b=lb))
    fw1, fb1 = _linear_init(keys[ki], num_inputs_final * in_features, REL_BOTTLENECK); ki += 1
    fw2, fb2 = _linear_init(keys[ki], REL_BOTTLENECK, out_features)
    # NOTE: the torch module also builds `final_linear`, which forward() never uses -> omitted.
    return dict(levels=levels, final=dict(w1=fw1, b1=fb1, w2=fw2, b2=fb2))


# ----------------------------------- main --------------------------------------

if __name__ == "__main__":
    B = 2
    num_inputs = 4       # == relation_size -> depth = 0.  The reference's torch.stack(outs)
    relation_size = 4    # only type-checks at depth == 0 (levels shrink the sequence length).
    in_features = 32
    out_features = 16

    key = jax.random.PRNGKey(0)
    kx, kp, kt = jax.random.split(key, 3)
    x = jax.random.normal(kx, (B, num_inputs, in_features), dtype=jnp.float32)
    raw_params = init_params(kp, num_inputs, in_features, out_features, relation_size)
    kparams = prepare_params(raw_params)     # pad / cast / fold once, outside the jit

    fwd = jax.jit(functools.partial(
        hierarchical_relation_forward, num_inputs=num_inputs, in_features=in_features,
        out_features=out_features, relation_size=relation_size))
    out = jax.block_until_ready(fwd(x, kparams))

    ref = reference_forward(
        x, raw_params, num_inputs=num_inputs, in_features=in_features,
        out_features=out_features, relation_size=relation_size)

    assert out.shape == (B, 1, out_features), out.shape
    assert bool(jnp.all(jnp.isfinite(out)))
    # bf16 weights + folded level linear -> loosened tolerance vs. the fp32 reference.
    assert bool(jnp.allclose(out, ref, atol=2e-2, rtol=2e-2)), \
        float(jnp.max(jnp.abs(out - ref)))

    # Directly exercise the fused per-level kernel as well (the hierarchical level path is
    # only reachable end-to-end for depth >= 1, where the reference itself would raise).
    kx2, kw = jax.random.split(kt)
    R = 6   # deliberately not sublane-aligned to exercise the row-padding path
    xin = jax.random.normal(kx2, (R, relation_size * in_features), dtype=jnp.float32)
    kk = jax.random.split(kw, 3)
    w1, b1 = _linear_init(kk[0], relation_size * in_features, REL_BOTTLENECK)
    w2, b2 = _linear_init(kk[1], REL_BOTTLENECK, in_features)
    lw, lb = _linear_init(kk[2], in_features, out_features)
    lvlp = prepare_level_params(w1, b1, w2, b2, lw, lb)
    rel, lin = relation_level(xin, lvlp["w1"], lvlp["b1"], lvlp["wc"], lvlp["bc"],
                              in_features, out_features)
    rel = rel.block_until_ready()
    lin = lin.block_until_ready()
    rel_r = _ref_relation_mlp(xin, w1, b1, w2, b2)
    lin_r = jnp.dot(rel_r, lw) + lb
    assert rel.shape == (R, in_features) and lin.shape == (R, out_features)
    assert bool(jnp.allclose(rel, rel_r, atol=2e-2, rtol=2e-2)), \
        float(jnp.max(jnp.abs(rel - rel_r)))
    assert bool(jnp.allclose(lin, lin_r, atol=2e-2, rtol=2e-2)), \
        float(jnp.max(jnp.abs(lin - lin_r)))

    print("KERNEL_OK")
</pallas_src>

<mosaic_0001>
module attributes {stable_mosaic.version = 11 : i64} {
  func.func @_relation_mlp_kernel(%arg0: i32, %arg1: memref<8x128xf32, #tpu.memory_space<vmem>>, %arg2: memref<128x512xbf16, #tpu.memory_space<vmem>>, %arg3: memref<1x512xf32, #tpu.memory_space<vmem>>, %arg4: memref<512x128xbf16, #tpu.memory_space<vmem>>, %arg5: memref<1x128xf32, #tpu.memory_space<vmem>>, %arg6: memref<8x128xf32, #tpu.memory_space<vmem>>) attributes {dimension_semantics = [#tpu.dimension_semantics<parallel>], iteration_bounds = array<i64: 1>, scalar_prefetch = 0 : i64, scratch_operands = 0 : i64, tpu.core_type = #tpu.core_type<tc>, window_params = [{transform_indices = @transform_0, window_bounds = array<i64: 8, 128>}, {pipeline_mode = #tpu.pipeline_mode<synchronous>, transform_indices = @transform_1, window_bounds = array<i64: 128, 512>}, {pipeline_mode = #tpu.pipeline_mode<synchronous>, transform_indices = @transform_2, window_bounds = array<i64: 1, 512>}, {pipeline_mode = #tpu.pipeline_mode<synchronous>, transform_indices = @transform_3, window_bounds = array<i64: 512, 128>}, {pipeline_mode = #tpu.pipeline_mode<synchronous>, transform_indices = @transform_4, window_bounds = array<i64: 1, 128>}, {transform_indices = @transform_5, window_bounds = array<i64: 8, 128>}]} {
    %c0 = arith.constant 0 : index
    %c0_0 = arith.constant 0 : index
    %0 = vector.load %arg1[%c0, %c0_0] : memref<8x128xf32, #tpu.memory_space<vmem>>, vector<8x128xf32>
    %cst = arith.constant 0.000000e+00 : f32
    %1 = vector.broadcast %cst : f32 to vector<8x128xf32>
    %2 = arith.maximumf %0, %1 : vector<8x128xf32>
    %3 = arith.truncf %2 : vector<8x128xf32> to vector<8x128xbf16>
    %c0_1 = arith.constant 0 : index
    %c0_2 = arith.constant 0 : index
    %4 = vector.load %arg2[%c0_1, %c0_2] : memref<128x512xbf16, #tpu.memory_space<vmem>>, vector<128x512xbf16>
    %cst_3 = arith.constant dense<0.000000e+00> : vector<8x512xf32>
    %5 = tpu.matmul %3, %4, %cst_3 {dimension_numbers = #tpu.dot_dimension_numbers<[1], [0], [0], [1], [0, 0, 1, 1], [], []>} : vector<8x128xbf16>, vector<128x512xbf16>, vector<8x512xf32> -> vector<8x512xf32>
    %c0_4 = arith.constant 0 : index
    %c0_5 = arith.constant 0 : index
    %6 = vector.load %arg3[%c0_4, %c0_5] : memref<1x512xf32, #tpu.memory_space<vmem>>, vector<1x512xf32>
    %7 = vector.broadcast %6 : vector<1x512xf32> to vector<8x512xf32>
    %8 = arith.addf %5, %7 : vector<8x512xf32>
    %cst_6 = arith.constant 0.000000e+00 : f32
    %9 = vector.broadcast %cst_6 : f32 to vector<8x512xf32>
    %10 = arith.maximumf %8, %9 : vector<8x512xf32>
    %11 = arith.truncf %10 : vector<8x512xf32> to vector<8x512xbf16>
    %c0_7 = arith.constant 0 : index
    %c0_8 = arith.constant 0 : index
    %12 = vector.load %arg4[%c0_7, %c0_8] : memref<512x128xbf16, #tpu.memory_space<vmem>>, vector<512x128xbf16>
    %cst_9 = arith.constant dense<0.000000e+00> : vector<8x128xf32>
    %13 = tpu.matmul %11, %12, %cst_9 {dimension_numbers = #tpu.dot_dimension_numbers<[1], [0], [0], [1], [0, 0, 1, 1], [], []>} : vector<8x512xbf16>, vector<512x128xbf16>, vector<8x128xf32> -> vector<8x128xf32>
    %c0_10 = arith.constant 0 : index
    %c0_11 = arith.constant 0 : index
    %14 = vector.load %arg5[%c0_10, %c0_11] : memref<1x128xf32, #tpu.memory_space<vmem>>, vector<1x128xf32>
    %15 = vector.broadcast %14 : vector<1x128xf32> to vector<8x128xf32>
    %16 = arith.addf %13, %15 : vector<8x128xf32>
    %c0_12 = arith.constant 0 : index
    %c0_13 = arith.constant 0 : index
    %17 = vector.load %arg6[%c0_12, %c0_13] : memref<8x128xf32, #tpu.memory_space<vmem>>, vector<8x128xf32>
    tpu.vector_store %arg6[%c0_12, %c0_13], %16 {strides = array<i32>} : memref<8x128xf32, #tpu.memory_space<vmem>>, vector<8x128xf32>,
    return
  }
  func.func @transform_0(%arg0: i32) -> (i32, i32) {
    %c0_i32 = arith.constant 0 : i32
    %c0_i32_0 = arith.constant 0 : i32
    return %arg0, %c0_i32 : i32, i32
  }
  func.func @transform_1(%arg0: i32) -> (i32, i32) {
    %c0_i32 = arith.constant 0 : i32
    %c0_i32_0 = arith.constant 0 : i32
    %c0_i32_1 = arith.constant 0 : i32
    return %c0_i32, %c0_i32_0 : i32, i32
  }
  func.func @transform_2(%arg0: i32) -> (i32, i32) {
    %c0_i32 = arith.constant 0 : i32
    %c0_i32_0 = arith.constant 0 : i32
    %c0_i32_1 = arith.constant 0 : i32
    return %c0_i32, %c0_i32_0 : i32, i32
  }
  func.func @transform_3(%arg0: i32) -> (i32, i32) {
    %c0_i32 = arith.constant 0 : i32
    %c0_i32_0 = arith.constant 0 : i32
    %c0_i32_1 = arith.constant 0 : i32
    return %c0_i32, %c0_i32_0 : i32, i32
  }
  func.func @transform_4(%arg0: i32) -> (i32, i32) {
    %c0_i32 = arith.constant 0 : i32
    %c0_i32_0 = arith.constant 0 : i32
    %c0_i32_1 = arith.constant 0 : i32
    return %c0_i32, %c0_i32_0 : i32, i32
  }
  func.func @transform_5(%arg0: i32) -> (i32, i32) {
    %c0_i32 = arith.constant 0 : i32
    %c0_i32_0 = arith.constant 0 : i32
    return %arg0, %c0_i32 : i32, i32
  }
}

</mosaic_0001>

<bundles_post_ra>
// kernel: hierarchical_relation_forward.1
= control target key start
LH: loop header
LB: loop body
LE: loop exit
PB: predicated region body
PF: predicated region fallthrough
CT: control target
= control target key end

     0   :  { %10 = vsyncpa [#allocation3], 0  ;;  %s1069_s0 = inlined_call_operand.vmem [shape: f32[8,128], index: 0, kind: input, shape index: {}]   ;;  %s1070_s1 = inlined_call_operand.hbm [shape: bf16[128,512], index: 1, kind: input, shape index: {}]   ;;  %s1071_s2 = inlined_call_operand.vmem [shape: f32[1,512], index: 2, kind: input, shape index: {}]   ;;  %s1072_s3 = inlined_call_operand.hbm [shape: bf16[512,128], index: 3, kind: input, shape index: {}]   ;;  %s1073_s4 = inlined_call_operand.vmem [shape: f32[1,128], index: 4, kind: input, shape index: {}]   ;;  %s1074_s5 = inlined_call_operand.vmem [shape: f32[8,128], index: 5, kind: output, shape index: {}]  }
   0x1   :  { %s18_s20 = sshll.u32 %s1070_s1, 4  ;;  %s19_s20 = int_to_ptr.hbm [resolvable:$true] %s18_s20 }
   0x2   :  { %11 = vsyncpa [#allocation5], 0  ;;  %s1015_s21 = smov [#allocation2]   ;;  %s33_s25 = sshll.u32 %s1072_s3, 4  ;;  %s34_s25 = int_to_ptr.hbm [resolvable:$true] %s33_s25 }
   0x3   :  { %s20_s22 = sshll.u32 %s1015_s21, 4  ;;  %s1016_s26 = smov 256   ;;  %s21_s22 = int_to_ptr.vmem [resolvable:$true] %s20_s22 }
   0x4   :  { %s1017_s27 = smov 16   ;;  %s1018_s28 = smov [#allocation4]  }
   0x5   :  { %26 = dma.hbm_to_vmem [thread:$0]  %s19_s20, 4096, %s21_s22, [#allocation3], %s1016_s26, %s1016_s26, %s1017_s27  }
   0x6   :  { %s35_s29 = sshll.u32 %s1018_s28, 4  ;;  %s1019_s30 = smov 64   ;;  %s36_s29 = int_to_ptr.vmem [resolvable:$true] %s35_s29 }
   0x7   :  { %s1020_s6 = smov 4  }
   0x8   :  { %41 = dma.hbm_to_vmem [thread:$0]  %s34_s25, 4096, %s36_s29, [#allocation5], %s1019_s30, %s1019_s30, %s1020_s6  }
   0x9   :  { %1011 = dma.done.wait [#allocation3], 4096  }
   0xa   :  { %1012 = vsyncadd [#allocation3], 4294963200 }
   0xb   :  { %1013 = dma.done.wait [#allocation5], 4096  }
   0xc   :  { %1014 = vsyncadd [#allocation5], 4294963200  ;;  %v758_v0 = vld [vmem:[#allocation2 + $0xe8] sm:$0xf]  ;;  %v923_v1 = vld [vmem:[#allocation2 + $0xf4] sm:$0xf0] }
   0xd   :  { %v921_v2 = vld [vmem:[#allocation2 + $0xec] sm:$0xf]  ;;  %v759_v3 = vor.u32 %v923_v1, %v758_v0  ;;  %v760_v4 = vld [vmem:[#allocation2 + $0xf8] sm:$0xf0]  ;;  %v750_v5 = vld [vmem:[#allocation2 + $0xe0] sm:$0xf] }
   0xe   :  { %v922_v6 = vld [vmem:[#allocation2 + $0xec] sm:$0xf0]  ;;  %v763_v7 = vor.u32 %v921_v2, %v760_v4  ;;  %v920_v9 = vld [vmem:[#allocation2 + $0xe4] sm:$0xf]  ;;  %v752_v10 = vld [vmem:[#allocation2 + $0xf0] sm:$0xf0] }
   0xf   :  { %v751_v8 = vor.u32 %v922_v6, %v750_v5  ;;  %v742_v11 = vld [vmem:[#allocation2 + $0xc8] sm:$0xf]  ;;  %283 = vmatpush.bf16.msra.mxu2 %v759_v3  ;;  %v755_v12 = vor.u32 %v920_v9, %v752_v10  ;;  %v919_v13 = vld [vmem:[#allocation2 + $0xd4] sm:$0xf0]  ;;  %v917_v14 = vld [vmem:[#allocation2 + $0xcc] sm:$0xf] }
  0x10   :  { %v744_v15 = vld [vmem:[#allocation2 + $0xd8] sm:$0xf0]  ;;  %296 = vmatpush.bf16.msra.mxu3 %v763_v7  ;;  %v743_v16 = vor.u32 %v919_v13, %v742_v11  ;;  %v734_v18 = vld [vmem:[#allocation2 + $0xc0] sm:$0xf]  ;;  %v918_v19 = vld [vmem:[#allocation2 + $0xcc] sm:$0xf0] }
  0x11   :  { %257 = vmatpush.bf16.msra.mxu0 %v751_v8  ;;  %v747_v17 = vor.u32 %v917_v14, %v744_v15  ;;  %v916_v20 = vld [vmem:[#allocation2 + $0xc4] sm:$0xf]  ;;  %270 = vmatpush.bf16.msra.mxu1 %v755_v12  ;;  %v735_v21 = vor.u32 %v918_v19, %v734_v18  ;;  %v736_v22 = vld [vmem:[#allocation2 + $0xd0] sm:$0xf0]  ;;  %v726_v23 = vld [vmem:[#allocation2 + $0xa8] sm:$0xf] }
  0x12   :  { %v915_v24 = vld [vmem:[#allocation2 + $0xb4] sm:$0xf0]  ;;  %v739_v25 = vor.u32 %v916_v20, %v736_v22  ;;  %v913_v26 = vld [vmem:[#allocation2 + $0xac] sm:$0xf]  ;;  %v728_v27 = vld [vmem:[#allocation2 + $0xb8] sm:$0xf0] }
  0x13   :  { %v718_v28 = vld [vmem:[#allocation2 + $0xa0] sm:$0xf]  ;;  %284 = vmatpush.bf16.msra.mxu2 %v743_v16  ;;  %v727_v29 = vor.u32 %v915_v24, %v726_v23  ;;  %v914_v30 = vld [vmem:[#allocation2 + $0xac] sm:$0xf0]  ;;  %v912_v31 = vld [vmem:[#allocation2 + $0xa4] sm:$0xf]  ;;  %v731_v33 = vor.u32 %v913_v26, %v728_v27 }
  0x14   :  { %v720_v32 = vld [vmem:[#allocation2 + $0xb0] sm:$0xf0]  ;;  %297 = vmatpush.bf16.msra.mxu3 %v747_v17  ;;  %v719_v34 = vor.u32 %v914_v30, %v718_v28  ;;  %v710_v35 = vld [vmem:[#allocation2 + $0x88] sm:$0xf]  ;;  %v911_v36 = vld [vmem:[#allocation2 + $0x94] sm:$0xf0] }
  0x15   :  { %258 = vmatpush.bf16.msra.mxu0 %v735_v21  ;;  %v909_v37 = vld [vmem:[#allocation2 + $0x8c] sm:$0xf]  ;;  %271 = vmatpush.bf16.msra.mxu1 %v739_v25  ;;  %v723_v38 = vor.u32 %v912_v31, %v720_v32  ;;  %v712_v39 = vld [vmem:[#allocation2 + $0x98] sm:$0xf0]  ;;  %v702_v40 = vld [vmem:[#allocation2 + $0x80] sm:$0xf]  ;;  %v711_v44 = vor.u32 %v911_v36, %v710_v35 }
  0x16   :  { %v910_v41 = vld [vmem:[#allocation2 + $0x8c] sm:$0xf0]  ;;  %v908_v42 = vld [vmem:[#allocation2 + $0x84] sm:$0xf]  ;;  %v704_v43 = vld [vmem:[#allocation2 + $0x90] sm:$0xf0]  ;;  %v715_v45 = vor.u32 %v909_v37, %v712_v39 }
  0x17   :  { %285 = vmatpush.bf16.msra.mxu2 %v727_v29  ;;  %v703_v46 = vor.u32 %v910_v41, %v702_v40  ;;  %v694_v47 = vld [vmem:[#allocation2 + $0x68] sm:$0xf]  ;;  %v907_v48 = vld [vmem:[#allocation2 + $0x74] sm:$0xf0]  ;;  %v905_v49 = vld [vmem:[#allocation2 + $0x6c] sm:$0xf]  ;;  %v707_v50 = vor.u32 %v908_v42, %v704_v43 }
  0x18   :  { %298 = vmatpush.bf16.msra.mxu3 %v731_v33  ;;  %v696_v51 = vld [vmem:[#allocation2 + $0x78] sm:$0xf0]  ;;  %v686_v52 = vld [vmem:[#allocation2 + $0x60] sm:$0xf]  ;;  %v906_v53 = vld [vmem:[#allocation2 + $0x6c] sm:$0xf0]  ;;  %v695_v56 = vor.u32 %v907_v48, %v694_v47 }
  0x19   :  { %259 = vmatpush.bf16.msra.mxu0 %v719_v34  ;;  %272 = vmatpush.bf16.msra.mxu1 %v723_v38  ;;  %v904_v54 = vld [vmem:[#allocation2 + $0x64] sm:$0xf]  ;;  %v688_v55 = vld [vmem:[#allocation2 + $0x70] sm:$0xf0]  ;;  %v699_v57 = vor.u32 %v905_v49, %v696_v51  ;;  %v687_v58 = vor.u32 %v906_v53, %v686_v52  ;;  %v678_v59 = vld [vmem:[#allocation2 + $0x48] sm:$0xf] }
  0x1a   :  { %v903_v60 = vld [vmem:[#allocation2 + $0x54] sm:$0xf0]  ;;  %v901_v61 = vld [vmem:[#allocation2 + $0x4c] sm:$0xf]  ;;  %v691_v62 = vor.u32 %v904_v54, %v688_v55  ;;  %v680_v63 = vld [vmem:[#allocation2 + $0x58] sm:$0xf0] }
  0x1b   :  { %286 = vmatpush.bf16.msra.mxu2 %v711_v44  ;;  %v670_v0 = vld [vmem:[#allocation2 + $0x40] sm:$0xf]  ;;  %v902_v1 = vld [vmem:[#allocation2 + $0x4c] sm:$0xf0]  ;;  %v900_v2 = vld [vmem:[#allocation2 + $0x44] sm:$0xf]  ;;  %v679_v4 = vor.u32 %v903_v60, %v678_v59  ;;  %v683_v5 = vor.u32 %v901_v61, %v680_v63 }
  0x1c   :  { %299 = vmatpush.bf16.msra.mxu3 %v715_v45  ;;  %v672_v3 = vld [vmem:[#allocation2 + $0x50] sm:$0xf0]  ;;  %v671_v6 = vor.u32 %v902_v1, %v670_v0  ;;  %v662_v7 = vld [vmem:[#allocation2 + $0x28] sm:$0xf]  ;;  %v899_v8 = vld [vmem:[#allocation2 + $0x34] sm:$0xf0] }
  0x1d   :  { %260 = vmatpush.bf16.msra.mxu0 %v703_v46  ;;  %273 = vmatpush.bf16.msra.mxu1 %v707_v50  ;;  %v897_v9 = vld [vmem:[#allocation2 + $0x2c] sm:$0xf]  ;;  %v675_v10 = vor.u32 %v900_v2, %v672_v3  ;;  %v664_v11 = vld [vmem:[#allocation2 + $0x38] sm:$0xf0]  ;;  %v654_v12 = vld [vmem:[#allocation2 + $0x20] sm:$0xf]  ;;  %v663_v16 = vor.u32 %v899_v8, %v662_v7 }
  0x1e   :  { %v898_v13 = vld [vmem:[#allocation2 + $0x2c] sm:$0xf0]  ;;  %v896_v14 = vld [vmem:[#allocation2 + $0x24] sm:$0xf]  ;;  %v656_v15 = vld [vmem:[#allocation2 + $0x30] sm:$0xf0]  ;;  %v667_v18 = vor.u32 %v897_v9, %v664_v11 }
  0x1f   :  { %287 = vmatpush.bf16.msra.mxu2 %v695_v56  ;;  %v52_v17 = vld [vmem:[%s1069_s0] sm:$0xff]  ;;  %v655_v19 = vor.u32 %v898_v13, %v654_v12  ;;  %v646_v20 = vld [vmem:[#allocation2 + $0x8] sm:$0xf]  ;;  %v895_v21 = vld [vmem:[#allocation2 + $0x14] sm:$0xf0]  ;;  %v659_v23 = vor.u32 %v896_v14, %v656_v15 }
  0x20   :  { %300 = vmatpush.bf16.msra.mxu3 %v699_v57  ;;  %v893_v22 = vld [vmem:[#allocation2 + $0xc] sm:$0xf]  ;;  %v648_v24 = vld [vmem:[#allocation2 + $0x18] sm:$0xf0]  ;;  %v638_v25 = vld [vmem:[#allocation2] sm:$0xf]  ;;  %v647_v30 = vor.u32 %v895_v21, %v646_v20 }
  0x21   :  { %261 = vmatpush.bf16.msra.mxu0 %v687_v58  ;;  %274 = vmatpush.bf16.msra.mxu1 %v691_v62  ;;  %v894_v26 = vld [vmem:[#allocation2 + $0xc] sm:$0xf0]  ;;  %v53_v27 = vmax.f32 %v52_v17, 0.0  ;;  %v892_v28 = vld [vmem:[#allocation2 + $0x4] sm:$0xf]  ;;  %v651_v31 = vor.u32 %v893_v22, %v648_v24  ;;  %v931_v34 = vld [vmem:[#allocation4 + $0x38] sm:$0xff] }
  0x22   :  { %v640_v29 = vld [vmem:[#allocation2 + $0x10] sm:$0xf0]  ;;  %v639_v32 = vor.u32 %v894_v26, %v638_v25  ;;  %v939_v36 = vld [vmem:[#allocation4 + $0x78] sm:$0xff]  ;;  %v929_v43 = vld [vmem:[#allocation4 + $0x28] sm:$0xff] }
  0x23   :  { %288 = vmatpush.bf16.msra.mxu2 %v679_v4  ;;  %v643_v33 = vor.u32 %v892_v28, %v640_v29  ;;  %v54_v35 = vpack.c.bf16 %v53_v27, %v53_v27  ;;  %v947_v37 = vld [vmem:[#allocation4 + $0xb8] sm:$0xff]  ;;  %v930_v39 = vld [vmem:[#allocation4 + $0x30] sm:$0xff]  ;;  %v937_v44 = vld [vmem:[#allocation4 + $0x68] sm:$0xff] }
  0x24   :  { %301 = vmatpush.bf16.msra.mxu3 %v683_v5  ;;  %v955_v38 = vld [vmem:[#allocation4 + $0xf8] sm:$0xff]  ;;  %v938_v40 = vld [vmem:[#allocation4 + $0x70] sm:$0xff]  ;;  %v945_v45 = vld [vmem:[#allocation4 + $0xa8] sm:$0xff] }
  0x25   :  { %262 = vmatpush.bf16.msra.mxu0 %v671_v6  ;;  %275 = vmatpush.bf16.msra.mxu1 %v675_v10  ;;  %v946_v41 = vld [vmem:[#allocation4 + $0xb0] sm:$0xff]  ;;  %v953_v46 = vld [vmem:[#allocation4 + $0xe8] sm:$0xff]  ;;  %v928_v47 = vld [vmem:[#allocation4 + $0x20] sm:$0xff] }
  0x26   :  { %v954_v42 = vld [vmem:[#allocation4 + $0xf0] sm:$0xff]  ;;  %v936_v48 = vld [vmem:[#allocation4 + $0x60] sm:$0xff]  ;;  %v927_v51 = vld [vmem:[#allocation4 + $0x18] sm:$0xff] }
  0x27   :  { %289 = vmatpush.bf16.msra.mxu2 %v663_v16  ;;  %v944_v49 = vld [vmem:[#allocation4 + $0xa0] sm:$0xff]  ;;  %v935_v52 = vld [vmem:[#allocation4 + $0x58] sm:$0xff]  ;;  %v926_v55 = vld [vmem:[#allocation4 + $0x10] sm:$0xff] }
  0x28   :  { %302 = vmatpush.bf16.msra.mxu3 %v667_v18  ;;  %v952_v50 = vld [vmem:[#allocation4 + $0xe0] sm:$0xff]  ;;  %v943_v53 = vld [vmem:[#allocation4 + $0x98] sm:$0xff]  ;;  %v934_v56 = vld [vmem:[#allocation4 + $0x50] sm:$0xff] }
  0x29   :  { %263 = vmatpush.bf16.msra.mxu0 %v655_v19  ;;  %276 = vmatpush.bf16.msra.mxu1 %v659_v23  ;;  %v951_v54 = vld [vmem:[#allocation4 + $0xd8] sm:$0xff]  ;;  %v942_v57 = vld [vmem:[#allocation4 + $0x90] sm:$0xff]  ;;  %v925_v59 = vld [vmem:[#allocation4 + $0x8] sm:$0xff] }
  0x2a   :  { %v950_v58 = vld [vmem:[#allocation4 + $0xd0] sm:$0xff]  ;;  %v933_v60 = vld [vmem:[#allocation4 + $0x48] sm:$0xff]  ;;  %v924_v63 = vld [vmem:[#allocation4] sm:$0xff] }
  0x2b   :  { %290 = vmatpush.bf16.msra.mxu2 %v647_v30  ;;  %v941_v61 = vld [vmem:[#allocation4 + $0x88] sm:$0xff]  ;;  %v932_v0 = vld [vmem:[#allocation4 + $0x40] sm:$0xff] }
  0x2c   :  { %303 = vmatpush.bf16.msra.mxu3 %v651_v31  ;;  %v949_v62 = vld [vmem:[#allocation4 + $0xc8] sm:$0xff]  ;;  %v940_v1 = vld [vmem:[#allocation4 + $0x80] sm:$0xff] }
  0x2d   :  { %264 = vmatpush.bf16.msra.mxu0 %v639_v32  ;;  %277 = vmatpush.bf16.msra.mxu1 %v643_v33  ;;  %v948_v2 = vld [vmem:[#allocation4 + $0xc0] sm:$0xff] }
  0x2e   :  { %291 = vmatmul.bf16.vlgmr.msra.gmra.mxu2 %v54_v35  ;;  %v87_v3 = vld [vmem:[%s1071_s2] sm:$0xf] }
  0x2f   :  { %304 = vmatmul.bf16.vlgmr.msra.gmra.mxu3 %v54_v35  ;;  %603 = vmatpush.bf16.msrb.mxu2 %v947_v37  ;;  %v89_v4 = vperm.slane %v87_v3, 0  ;;  %v90_v5 = vperm.slane %v87_v3, 1  ;;  %v91_v10 = vperm.slane %v87_v3, 2  ;;  %v92_v12 = vperm.slane %v87_v3, 3  ;;  %v962_v28 = vld [vmem:[%s1073_s4] ss:$0 sm:$0xff] }
  0x30   :  { %265 = vmatmul.bf16.vlgmr.msra.gmra.mxu0 %v54_v35  ;;  %278 = vmatmul.bf16.vlgmr.msra.gmra.mxu1 %v54_v35 }
  0x31   :  { %577 = vmatpush.bf16.msrb.mxu0 %v931_v34  ;;  %590 = vmatpush.bf16.msrb.mxu1 %v939_v36 }
  0x32   :  { %616 = vmatpush.bf16.msrb.mxu3 %v955_v38 }
  0x33   :  { %604 = vmatpush.bf16.msrb.mxu2 %v946_v41 }
  0x35   :  { %578 = vmatpush.bf16.msrb.mxu0 %v930_v39  ;;  %591 = vmatpush.bf16.msrb.mxu1 %v938_v40 }
  0x36   :  { %617 = vmatpush.bf16.msrb.mxu3 %v954_v42 }
  0x37   :  { %605 = vmatpush.bf16.msrb.mxu2 %v945_v45 }
  0x39   :  { %579 = vmatpush.bf16.msrb.mxu0 %v929_v43  ;;  %592 = vmatpush.bf16.msrb.mxu1 %v937_v44 }
  0x3a   :  { %618 = vmatpush.bf16.msrb.mxu3 %v953_v46 }
  0x3b   :  { %606 = vmatpush.bf16.msrb.mxu2 %v944_v49 }
  0x3d   :  { %580 = vmatpush.bf16.msrb.mxu0 %v928_v47  ;;  %593 = vmatpush.bf16.msrb.mxu1 %v936_v48 }
  0x3e   :  { %619 = vmatpush.bf16.msrb.mxu3 %v952_v50 }
  0x3f   :  { %607 = vmatpush.bf16.msrb.mxu2 %v943_v53 }
  0x41   :  { %581 = vmatpush.bf16.msrb.mxu0 %v927_v51  ;;  %594 = vmatpush.bf16.msrb.mxu1 %v935_v52 }
  0x42   :  { %620 = vmatpush.bf16.msrb.mxu3 %v951_v54 }
  0x43   :  { %608 = vmatpush.bf16.msrb.mxu2 %v942_v57 }
  0x45   :  { %582 = vmatpush.bf16.msrb.mxu0 %v926_v55  ;;  %595 = vmatpush.bf16.msrb.mxu1 %v934_v56 }
  0x46   :  { %621 = vmatpush.bf16.msrb.mxu3 %v950_v58 }
  0x47   :  { %609 = vmatpush.bf16.msrb.mxu2 %v941_v61 }
  0x49   :  { %583 = vmatpush.bf16.msrb.mxu0 %v925_v59  ;;  %596 = vmatpush.bf16.msrb.mxu1 %v933_v60 }
  0x4a   :  { %622 = vmatpush.bf16.msrb.mxu3 %v949_v62 }
  0x4b   :  { %610 = vmatpush.bf16.msrb.mxu2 %v940_v1 }
  0x4d   :  { %584 = vmatpush.bf16.msrb.mxu0 %v924_v63  ;;  %597 = vmatpush.bf16.msrb.mxu1 %v932_v0 }
  0x4e   :  { %623 = vmatpush.bf16.msrb.mxu3 %v948_v2 }
  0xad   :  { %v266_v6 = vpop.f32.mrf.mxu0  ;;  %v279_v8 = vpop.f32.mrf.mxu1 }
  0xae   :  { %v267_v7 = vadd.f32 %v266_v6, %v89_v4  ;;  %v280_v9 = vadd.f32 %v279_v8, %v90_v5 }
  0xb0   :  { %v309_v11 = vmax.f32 %v267_v7, 0.0  ;;  %v310_v13 = vmax.f32 %v280_v9, 0.0 }
  0xb1   :  { %v292_v15 = vpop.f32.mrf.mxu2 }
  0xb2   :  { %v313_v14 = vpack.c.bf16 %v309_v11, %v309_v11  ;;  %v314_v16 = vpack.c.bf16 %v310_v13, %v310_v13  ;;  %v293_v17 = vadd.f32 %v292_v15, %v91_v10  ;;  %v305_v18 = vpop.f32.mrf.mxu3 }
  0xb3   :  { %v306_v19 = vadd.f32 %v305_v18, %v92_v12 }
  0xb4   :  { %585 = vmatmul.bf16.vlgmr.msrb.gmra.mxu0 %v313_v14  ;;  %v311_v20 = vmax.f32 %v293_v17, 0.0  ;;  %598 = vmatmul.bf16.vlgmr.msrb.gmra.mxu1 %v314_v16 }
  0xb5   :  { %v268_v21 = vpop.f32.mrf.mxu0  ;;  %v312_v22 = vmax.f32 %v306_v19, 0.0  ;;  %v281_v23 = vpop.f32.mrf.mxu1 }
  0xb6   :  { %v315_v24 = vpack.c.bf16 %v311_v20, %v311_v20 }
  0xb7   :  { %v316_v25 = vpack.c.bf16 %v312_v22, %v312_v22 }
  0xb8   :  { %611 = vmatmul.bf16.vlgmr.msrb.gmra.mxu2 %v315_v24 }
  0xb9   :  { %624 = vmatmul.bf16.vlgmr.msrb.gmra.mxu3 %v316_v25  ;;  %v294_v26 = vpop.f32.mrf.mxu2 }
  0xba   :  { %v307_v27 = vpop.f32.mrf.mxu3 }
 0x131   :  { %v586_v29 = vpop.f32.mrf.mxu0  ;;  %v599_v30 = vpop.f32.mrf.mxu1 }
 0x132   :  { %v587_v31 = vadd.f32 %v962_v28, %v586_v29 }
 0x134   :  { %v600_v32 = vadd.f32 %v599_v30, %v587_v31 }
 0x139   :  { %v588_v33 = vpop.f32.mrf.mxu0  ;;  %v601_v34 = vpop.f32.mrf.mxu1 }
 0x13b   :  { %v612_v35 = vpop.f32.mrf.mxu2 }
 0x13c   :  { %v613_v36 = vadd.f32 %v612_v35, %v600_v32  ;;  %v625_v37 = vpop.f32.mrf.mxu3 }
 0x13e   :  { %v626_v38 = vadd.f32 %v625_v37, %v613_v36 }
 0x140   :  { %629 = vst [vmem:[%s1074_s5] sm:$0xff] %v626_v38 }
 0x143   :  { %v614_v39 = vpop.f32.mrf.mxu2 }
 0x144   :  { %v627_v40 = vpop.f32.mrf.mxu3 }
 0x145   :  { %634 = vsyncpa [#allocation3], 1 }
 0x146   :  { %635 = vsyncpa [#allocation5], 1 }

</bundles_post_ra>
